<compile_context>
chip_gen: v5e
topology: v5e:2x2
jax: 0.10.0
libtpu: 0.0.40
codegen_flags: <defaults>
</compile_context>

<pallas_src>
import functools

import jax
import jax.numpy as jnp
from jax.experimental import pallas as pl
from jax.experimental.pallas import tpu as pltpu


def _ofst_l1_kernel(labels_ref, pred_ref, gt_ref, o_ref, acc_ref, *,
                    TM, THW, ACCW, HW, M, nHW_inner,
                    need_lane_mask, need_row_mask):
    """One grid step (b, s, i, j).

    labels_ref : (1, 1, THW)      raw rgb_labels slice (mask computed here)
    pred_ref   : (1, TM, THW)
    gt_ref     : (1, TM, THW)
    o_ref      : (1, 1, 1, TM, 1) per-row masked-|diff| sums, written once
    acc_ref    : (TM, ACCW) f32   lane-parallel partial sums (VMEM scratch)
    """
    s = pl.program_id(1)   # spatial split (v7x second-core work)
    i = pl.program_id(2)   # row block
    j = pl.program_id(3)   # spatial block within this split (reduction axis)

    @pl.when(j == 0)
    def _init():
        acc_ref[...] = jnp.zeros_like(acc_ref)

    p = pred_ref[0].astype(jnp.float32)          # (TM, THW)
    g = gt_ref[0].astype(jnp.float32)            # (TM, THW)
    lab = labels_ref[0]                          # (1, THW)

    # weight mask computed in-kernel; broadcast over the TM rows
    cond = lab > 1e-8
    if need_lane_mask:
        # global spatial offset of this block; ragged / phantom lanes -> False
        offset = (s * nHW_inner + j) * THW
        lane_ids = jax.lax.broadcasted_iota(jnp.int32, (1, THW), 1)
        cond = cond & (lane_ids + offset < HW)
    if need_row_mask:
        row_ids = jax.lax.broadcasted_iota(jnp.int32, (TM, 1), 0)
        cond = cond & (row_ids + i * TM < M)

    x = jnp.where(cond, jnp.abs(p - g), 0.0)     # (TM, THW) f32, OOB garbage -> 0

    # Lane-parallel accumulation: tile-aligned 128-wide slab adds (pure VPU);
    # the cross-lane XLU reduce is deferred to the final spatial step.
    part = x[:, 0:ACCW]
    for k in range(1, THW // ACCW):
        part = part + x[:, k * ACCW:(k + 1) * ACCW]
    acc_ref[...] += part

    @pl.when(j == nHW_inner - 1)
    def _fin():
        o_ref[0, 0, 0] = jnp.sum(acc_ref[...], axis=-1, keepdims=True)


@functools.partial(jax.jit, static_argnames=("normalize", "reduce"))
def ofst_map_l1_loss(rgb_labels, pred, gt, normalize=True, reduce=True):
    """JAX/Pallas equivalent of OfstMapL1Loss().forward(rgb_labels, pred, gt)."""
    bs, n_kpts, c, h, w = pred.shape
    HW = h * w
    M = n_kpts * c

    # ---- tile sizes (no padded copies of the big tensors are ever made) ----
    if M <= 512:
        TM = M                      # full-dim row block (satisfies (8,128) rule)
    else:
        TM = 128                    # multiple of 8; ragged last block row-masked
    nM = pl.cdiv(M, TM)

    if HW < 128:
        THW = HW                    # full-dim spatial block
    else:
        budget_elems = (2 * 1024 * 1024) // (4 * TM)       # ~2 MiB / input block
        THW = max(128, min((budget_elems // 128) * 128, (HW // 128) * 128))
    nHW = pl.cdiv(HW, THW)
    ACCW = min(THW, 128)

    # v7x: keep both TensorCores busy even when bs * nM == 1
    nsplit = 2 if (bs * nM == 1 and nHW >= 2) else 1
    nHW_inner = pl.cdiv(nHW, nsplit)

    need_lane_mask = (HW % THW != 0) or (nsplit * nHW_inner != nHW)
    need_row_mask = (M % TM != 0)

    if nsplit * nHW_inner == nHW:
        sp = lambda s, j: s * nHW_inner + j
    else:
        # clamp phantom block indices; their contribution is lane-masked to zero
        sp = lambda s, j: jnp.minimum(s * nHW_inner + j, nHW - 1)

    labels3 = rgb_labels.reshape(bs, 1, HW)      # view-like reshapes only
    pred3 = pred.reshape(bs, M, HW)
    gt3 = gt.reshape(bs, M, HW)

    kernel = functools.partial(
        _ofst_l1_kernel, TM=TM, THW=THW, ACCW=ACCW, HW=HW, M=M,
        nHW_inner=nHW_inner, need_lane_mask=need_lane_mask,
        need_row_mask=need_row_mask)

    row_sums = pl.pallas_call(
        kernel,
        out_shape=jax.ShapeDtypeStruct((bs, nsplit, nM, TM, 1), jnp.float32),
        grid_spec=pltpu.PrefetchScalarGridSpec(
            num_scalar_prefetch=0,
            grid=(bs, nsplit, nM, nHW_inner),
            in_specs=[
                pl.BlockSpec((1, 1, THW), lambda b, s, i, j: (b, 0, sp(s, j))),
                pl.BlockSpec((1, TM, THW), lambda b, s, i, j: (b, i, sp(s, j))),
                pl.BlockSpec((1, TM, THW), lambda b, s, i, j: (b, i, sp(s, j))),
            ],
            out_specs=pl.BlockSpec((1, 1, 1, TM, 1),
                                   lambda b, s, i, j: (b, s, i, 0, 0)),
            scratch_shapes=[pltpu.VMEM((TM, ACCW), jnp.float32)],
        ),
        compiler_params=pltpu.CompilerParams(
            dimension_semantics=("parallel", "parallel", "parallel", "arbitrary")),
    )(labels3, pred3, gt3)

    # ---- tiny finalize in the wrapper ----
    per_row = row_sums.sum(axis=1).reshape(bs, nM * TM)[:, :M]   # (bs, M)
    numer = per_row.reshape(bs, n_kpts, c).sum(axis=2)           # (bs, n_kpts)

    # denominator: c * (# valid pixels per batch); labels pass is tiny (~1/(2M)
    # of the pred/gt traffic), so it stays as a plain XLA reduction.
    wsum = jnp.sum((rgb_labels > 1e-8).astype(jnp.float32).reshape(bs, -1), axis=1)

    if normalize:
        in_loss = numer / (c * wsum[:, None] + 0.001)            # (bs, n_kpts)
        if reduce:
            return jnp.mean(in_loss)
        return in_loss
    else:
        if reduce:
            # mean over every element of the masked |diff| map
            return jnp.sum(numer) / (bs * n_kpts * c * h * w)
        # TODO(synk): normalize=False & reduce=False returns the full masked
        # |diff| map (bs, n_kpts, c, h, w); not produced by this reduction kernel.
        raise NotImplementedError("normalize=False, reduce=False not supported")


def _reference(rgb_labels, pred, gt):
    """Pure-JAX reference mirroring the PyTorch forward (default flags)."""
    bs, n_kpts, c, h, w = pred.shape
    wgt = (rgb_labels > 1e-8).astype(jnp.float32).reshape(bs, 1, 1, h, w)
    wgt = jnp.broadcast_to(wgt, (bs, n_kpts, c, h, w))
    abs_diff = jnp.abs(pred - gt) * wgt
    numer = jnp.sum(abs_diff.reshape(bs, n_kpts, -1), axis=2)
    denom = jnp.sum(wgt.reshape(bs, n_kpts, -1), axis=2) + 0.001
    return jnp.mean(numer / denom)


if __name__ == "__main__":
    key = jax.random.PRNGKey(0)
    k1, k2, k3 = jax.random.split(key, 3)

    # HW = 144 (> 128, not a multiple of 128) exercises the ragged lane-mask path
    bs, n_kpts, c, h, w = 2, 4, 3, 12, 12

    rgb_labels = jax.random.uniform(k1, (bs, h, w), jnp.float32)
    # zero out some pixels so the mask has both valid and invalid entries
    rgb_labels = jnp.where(rgb_labels > 0.5, rgb_labels, 0.0)
    pred = jax.random.normal(k2, (bs, n_kpts, c, h, w), jnp.float32)
    gt = jax.random.normal(k3, (bs, n_kpts, c, h, w), jnp.float32)

    loss = ofst_map_l1_loss(rgb_labels, pred, gt)
    loss = jax.block_until_ready(loss)

    ref = _reference(rgb_labels, pred, gt)
    assert jnp.allclose(loss, ref, rtol=1e-5, atol=1e-6), (loss, ref)

    print("KERNEL_OK")
</pallas_src>

<mosaic_0001>
module attributes {stable_mosaic.version = 11 : i64} {
  func.func @_ofst_l1_kernel(%arg0: i32, %arg1: i32, %arg2: i32, %arg3: i32, %arg4: memref<1x1x128xf32, #tpu.memory_space<vmem>>, %arg5: memref<1x12x128xf32, #tpu.memory_space<vmem>>, %arg6: memref<1x12x128xf32, #tpu.memory_space<vmem>>, %arg7: memref<1x1x1x12x1xf32, #tpu.memory_space<vmem>>, %arg8: memref<12x128xf32, #tpu.memory_space<vmem>>) attributes {dimension_semantics = [#tpu.dimension_semantics<parallel>, #tpu.dimension_semantics<parallel>, #tpu.dimension_semantics<parallel>, #tpu.dimension_semantics<arbitrary>], iteration_bounds = array<i64: 2, 1, 1, 2>, scalar_prefetch = 0 : i64, scratch_operands = 1 : i64, tpu.core_type = #tpu.core_type<tc>, window_params = [{transform_indices = @transform_0, window_bounds = array<i64: 1, 1, 128>}, {transform_indices = @transform_1, window_bounds = array<i64: 1, 12, 128>}, {transform_indices = @transform_2, window_bounds = array<i64: 1, 12, 128>}, {transform_indices = @transform_3, window_bounds = array<i64: 1, 1, 1, 12, 1>}]} {
    %c0_i32 = arith.constant 0 : i32
    %0 = arith.cmpi eq, %arg3, %c0_i32 : i32
    %1 = arith.extui %0 : i1 to i32
    %c0_i32_0 = arith.constant 0 : i32
    %2 = arith.cmpi ne, %1, %c0_i32_0 : i32
    scf.if %2 {
      %cst_15 = arith.constant 0.000000e+00 : f32
      %32 = vector.broadcast %cst_15 : f32 to vector<12x128xf32>
      %c0_16 = arith.constant 0 : index
      %c0_17 = arith.constant 0 : index
      %33 = vector.load %arg8[%c0_16, %c0_17] : memref<12x128xf32, #tpu.memory_space<vmem>>, vector<12x128xf32>
      tpu.vector_store %arg8[%c0_16, %c0_17], %32 {strides = array<i32>} : memref<12x128xf32, #tpu.memory_space<vmem>>, vector<12x128xf32>,
    } else {
    }
    %c0 = arith.constant 0 : index
    %c0_1 = arith.constant 0 : index
    %c0_2 = arith.constant 0 : index
    %3 = vector.load %arg5[%c0, %c0_1, %c0_2] : memref<1x12x128xf32, #tpu.memory_space<vmem>>, vector<1x12x128xf32>
    %4 = vector.shape_cast %3 : vector<1x12x128xf32> to vector<12x128xf32>
    %c0_3 = arith.constant 0 : index
    %c0_4 = arith.constant 0 : index
    %c0_5 = arith.constant 0 : index
    %5 = vector.load %arg6[%c0_3, %c0_4, %c0_5] : memref<1x12x128xf32, #tpu.memory_space<vmem>>, vector<1x12x128xf32>
    %6 = vector.shape_cast %5 : vector<1x12x128xf32> to vector<12x128xf32>
    %c0_6 = arith.constant 0 : index
    %c0_7 = arith.constant 0 : index
    %c0_8 = arith.constant 0 : index
    %7 = vector.load %arg4[%c0_6, %c0_7, %c0_8] : memref<1x1x128xf32, #tpu.memory_space<vmem>>, vector<1x1x128xf32>
    %8 = vector.shape_cast %7 : vector<1x1x128xf32> to vector<1x128xf32>
    %cst = arith.constant 9.99999993E-9 : f32
    %9 = vector.broadcast %cst : f32 to vector<1x128xf32>
    %10 = arith.cmpf ogt, %8, %9 : vector<1x128xf32>
    %c2_i32 = arith.constant 2 : i32
    %11 = arith.muli %arg1, %c2_i32 : i32
    %12 = arith.addi %11, %arg3 : i32
    %c128_i32 = arith.constant 128 : i32
    %13 = arith.muli %12, %c128_i32 : i32
    %14 = tpu.iota {dimensions = array<i32: 1>} : vector<1x128xi32>
    %15 = vector.broadcast %13 : i32 to vector<1x128xi32>
    %16 = arith.addi %14, %15 : vector<1x128xi32>
    %c144_i32 = arith.constant 144 : i32
    %17 = vector.broadcast %c144_i32 : i32 to vector<1x128xi32>
    %18 = arith.cmpi slt, %16, %17 : vector<1x128xi32>
    %19 = arith.andi %10, %18 : vector<1x128xi1>
    %20 = arith.subf %4, %6 : vector<12x128xf32>
    %21 = math.absf %20 : vector<12x128xf32>
    %cst_9 = arith.constant 0.000000e+00 : f32
    %22 = vector.shape_cast %19 : vector<1x128xi1> to vector<1x128xi1>
    %23 = vector.broadcast %22 : vector<1x128xi1> to vector<12x128xi1>
    %24 = vector.broadcast %cst_9 : f32 to vector<12x128xf32>
    %25 = arith.select %23, %21, %24 : vector<12x128xi1>, vector<12x128xf32>
    %c0_10 = arith.constant 0 : index
    %c0_11 = arith.constant 0 : index
    %26 = vector.load %arg8[%c0_10, %c0_11] : memref<12x128xf32, #tpu.memory_space<vmem>>, vector<12x128xf32>
    %27 = arith.addf %26, %25 : vector<12x128xf32>
    %c0_12 = arith.constant 0 : index
    %c0_13 = arith.constant 0 : index
    %28 = vector.load %arg8[%c0_12, %c0_13] : memref<12x128xf32, #tpu.memory_space<vmem>>, vector<12x128xf32>
    tpu.vector_store %arg8[%c0_12, %c0_13], %27 {strides = array<i32>} : memref<12x128xf32, #tpu.memory_space<vmem>>, vector<12x128xf32>,
    %c1_i32 = arith.constant 1 : i32
    %29 = arith.cmpi eq, %arg3, %c1_i32 : i32
    %30 = arith.extui %29 : i1 to i32
    %c0_i32_14 = arith.constant 0 : i32
    %31 = arith.cmpi ne, %30, %c0_i32_14 : i32
    scf.if %31 {
      %c0_15 = arith.constant 0 : index
      %c0_16 = arith.constant 0 : index
      %32 = vector.load %arg8[%c0_15, %c0_16] : memref<12x128xf32, #tpu.memory_space<vmem>>, vector<12x128xf32>
      %cst_17 = arith.constant dense<0.000000e+00> : vector<12xf32>
      %33 = vector.multi_reduction <add>, %32, %cst_17 [1] : vector<12x128xf32> to vector<12xf32>
      %34 = vector.shape_cast %33 : vector<12xf32> to vector<12x1xf32>
      %c0_18 = arith.constant 0 : index
      %c0_19 = arith.constant 0 : index
      %c0_20 = arith.constant 0 : index
      %c0_21 = arith.constant 0 : index
      %c0_22 = arith.constant 0 : index
      %35 = vector.load %arg7[%c0_18, %c0_19, %c0_20, %c0_21, %c0_22] : memref<1x1x1x12x1xf32, #tpu.memory_space<vmem>>, vector<1x1x1x12x1xf32>
      %36 = vector.shape_cast %35 : vector<1x1x1x12x1xf32> to vector<12x1xf32>
      %37 = vector.shape_cast %34 : vector<12x1xf32> to vector<1x1x1x12x1xf32>
      tpu.vector_store %arg7[%c0_18, %c0_19, %c0_20, %c0_21, %c0_22], %37 {strides = array<i32>} : memref<1x1x1x12x1xf32, #tpu.memory_space<vmem>>, vector<1x1x1x12x1xf32>,
    } else {
    }
    return
  }
  func.func @transform_0(%arg0: i32, %arg1: i32, %arg2: i32, %arg3: i32) -> (i32, i32, i32) {
    %c2_i32 = arith.constant 2 : i32
    %0 = arith.muli %arg1, %c2_i32 : i32
    %1 = arith.addi %0, %arg3 : i32
    %c0_i32 = arith.constant 0 : i32
    %c0_i32_0 = arith.constant 0 : i32
    return %arg0, %c0_i32, %1 : i32, i32, i32
  }
  func.func @transform_1(%arg0: i32, %arg1: i32, %arg2: i32, %arg3: i32) -> (i32, i32, i32) {
    %c2_i32 = arith.constant 2 : i32
    %0 = arith.muli %arg1, %c2_i32 : i32
    %1 = arith.addi %0, %arg3 : i32
    %c0_i32 = arith.constant 0 : i32
    return %arg0, %arg2, %1 : i32, i32, i32
  }
  func.func @transform_2(%arg0: i32, %arg1: i32, %arg2: i32, %arg3: i32) -> (i32, i32, i32) {
    %c2_i32 = arith.constant 2 : i32
    %0 = arith.muli %arg1, %c2_i32 : i32
    %1 = arith.addi %0, %arg3 : i32
    %c0_i32 = arith.constant 0 : i32
    return %arg0, %arg2, %1 : i32, i32, i32
  }
  func.func @transform_3(%arg0: i32, %arg1: i32, %arg2: i32, %arg3: i32) -> (i32, i32, i32, i32, i32) {
    %c0_i32 = arith.constant 0 : i32
    %c0_i32_0 = arith.constant 0 : i32
    %c0_i32_1 = arith.constant 0 : i32
    return %arg0, %arg1, %arg2, %c0_i32, %c0_i32_0 : i32, i32, i32, i32, i32
  }
}

</mosaic_0001>

<bundles_post_ra>
// kernel: ofst_map_l1_loss.1
= control target key start
LH: loop header
LB: loop body
LE: loop exit
PB: predicated region body
PF: predicated region fallthrough
CT: control target
= control target key end

     0   :  { %s762_s12 = smov 0   ;;  %s764_s13 = smov 0   ;;  %s877_s0 = inlined_call_operand.vmem [shape: f32[2,1,144], index: 0, kind: input, shape index: {}]   ;;  %s878_s1 = inlined_call_operand.vmem [shape: f32[2,12,144], index: 1, kind: input, shape index: {}]   ;;  %s879_s2 = inlined_call_operand.vmem [shape: f32[2,12,144], index: 2, kind: input, shape index: {}]   ;;  %s880_s3 = inlined_call_operand.vmem [shape: f32[2,1,1,12,1], index: 3, kind: output, shape index: {}]  }
   0x1   :  { %s766_s14 = smov 0   ;;  %s768_s15 = smov 0  }
   0x2   :  { %s770_s16 = smov 0   ;;  %s772_s17 = smov 0  }
   0x3   :  { %s774_s18 = smov 0  }
   0x4 LB: > { %s28_s19 = sadd.s32 1, %s730_s16  ;;  %s39_s20 = sadd.s32 1, %s734_s17  ;;  %s738_s18 = sphi %s774_s18, %s13_s18   ;;  %s734_s17 = sphi %s772_s17, %s887_s17   ;;  %s730_s16 = sphi %s770_s16, %s886_s16   ;;  %s726_s15 = sphi %s768_s15, %s885_s15   ;;  %s722_s14 = sphi %s766_s14, %s884_s14   ;;  %s718_s13 = sphi %s764_s13, %s883_s13   ;;  %s714_s12 = sphi %s762_s12, %s882_s12  }
   0x5   : > { %p29_p0 = scmp.ge.s32.totalorder %s28_s19, 2  ;;  %p93_p1 = scmp.ne.s32.totalorder %s718_s13, %s714_s12 }
   0x6   : > { %p94_p2 = scmp.eq.s32.totalorder %s738_s18, 0  ;;  %s86_s25 = sadd.s32 1, %s718_s13 }
   0x7   : > { %s889_s19 = smov (%p29_p0, %s28_s19), 0  ;;  %s891_s20 = smov (!%p29_p0, %s39_s20), %s734_s17 }
   0x8   : > { %p805_p3 = por %p94_p2, %p93_p1  ;;  %p41_p4 = scmp.ge.s32.totalorder %s891_s20, 2 }
   0x9   : > { %s82_s22 = ssub.s32 %s730_s16, %s889_s19  ;;  %p607_p6 = scmp.ge.s32.totalorder %s738_s18, 4 }
   0xa   : > { %s893_s20 = smov (%p41_p4, %s891_s20), 0 }
   0xb   : > { %s79_s23 = ssub.s32 %s734_s17, %s893_s20  ;;  %183 = sbr.rel (%p607_p6) target bundleno = 32 (0x20), region = 16 }
   0xc   : > { %s83_s24 = sor.u32 %s82_s22, %s79_s23 }
   0xd   : > { %p84_p5 = scmp.eq.s32.totalorder %s83_s24, 0 }
   0xf   : > { %s817_s26 = scalar_select %p84_p5, %s718_s13, %s86_s25  }
  0x10   : > { %200 = sbr.rel (!%p805_p3) target bundleno = 24 (0x18), region = 24  ;;  %s202_s27 = sand.u32 (%p805_p3), 1, %s718_s13  }
  0x11   : > { %s609_s28 = sshll.u32 (%p805_p3), %s734_s17, 2  ;;  %s608_s29 = sshll.u32 (%p805_p3), %s202_s27, 4 }
  0x12   : > { %s211_s30 = sadd.s32 (%p805_p3), %s730_s16, %s609_s28  ;;  %s204_s8 = scalar_lea.vmem (%p805_p3), [#allocation3], %s608_s29 }
  0x13   : > { %s610_s4 = sshll.u32 (%p805_p3), %s211_s30, 3 }
  0x14   : > { %s213_s7 = scalar_lea.vmem (%p805_p3), %s878_s1, %s610_s4 }
  0x15   : > { %v244_v0 = vld [vmem:[%s213_s7] sm:$0xff]  ;;  %v246_v1 = vld [vmem:[%s213_s7 + $0x10] sm:$0xff] }
  0x16   : > { %245 = vst [vmem:[%s204_s8] sm:$0xff] %v244_v0 }
  0x17   : > { %247 = vst [vmem:[%s204_s8 + $0x8] sm:$0xff] %v246_v1 }
  0x18 PF: > { %253 = sbr.rel (!%p805_p3) target bundleno = 32 (0x20), region = 62  ;;  %s255_s9 = sand.u32 (%p805_p3), 1, %s718_s13  }
  0x19   : > { %s612_s10 = sshll.u32 (%p805_p3), %s734_s17, 2  ;;  %s611_s11 = sshll.u32 (%p805_p3), %s255_s9, 4 }
  0x1a   : > { %s264_s22 = sadd.s32 (%p805_p3), %s730_s16, %s612_s10  ;;  %s257_s28 = scalar_lea.vmem (%p805_p3), [#allocation4], %s611_s11 }
  0x1b   : > { %s613_s23 = sshll.u32 (%p805_p3), %s264_s22, 3 }
  0x1c   : > { %s266_s27 = scalar_lea.vmem (%p805_p3), %s879_s2, %s613_s23 }
  0x1d   : > { %v297_v2 = vld [vmem:[%s266_s27] sm:$0xff]  ;;  %v299_v3 = vld [vmem:[%s266_s27 + $0x10] sm:$0xff] }
  0x1e   : > { %298 = vst [vmem:[%s257_s28] sm:$0xff] %v297_v2 }
  0x1f   : > { %300 = vst [vmem:[%s257_s28 + $0x8] sm:$0xff] %v299_v3 }
  0x20 PF: > { %p614_p7 = scmp.ge.s32.totalorder %s738_s18, 1  ;;  %p305_p8 = scmp.lt.s32.totalorder %s738_s18, 5 }
  0x22   : > { %p306_p9 = pnand %p614_p7, %p305_p8 }
  0x23   : > { %s312_s21 = sand.u32 (!%p306_p9), 1, %s714_s12   ;;  %p365_p10 = scmp.lt.s32.totalorder (!%p306_p9), %s726_s15, 1 }
  0x24   : > { %309 = sbr.rel (%p306_p9) target bundleno = 197 (0xc5), region = 100  ;;  %s615_s29 = sshll.u32 (!%p306_p9), %s312_s21, 4 }
  0x25   : > { %p367_p11 = scmp.lt.s32.totalorder (!%p306_p9), %s722_s14, 1  ;;  %s314_s23 = scalar_lea.vmem (!%p306_p9), [#allocation3], %s615_s29 }
  0x26   : > { %s321_s24 = scalar_lea.vmem (!%p306_p9), [#allocation4], %s615_s29  ;;  %p620_p12 = scmp.ne.s32.totalorder (!%p306_p9), %s722_s14, 0 }
  0x29   : > { %s895_s15 = smov (!%p365_p10, %s726_s15), 1  ;;  %396 = sbr.rel (%p620_p12) target bundleno = 49 (0x31), region = 112 }
  0x2a   : > { %s368_s30 = scalar_select %p367_p11, %s722_s14, 1 }
  0x2b   : > { %s617_s4 = sshll.u32 %s895_s15, 1  ;;  %s625_s5 = sshll.u32 %s895_s15, 4 }
  0x2c   : > { %s370_s6 = sadd.s32 %s617_s4, %s368_s30  ;;  %s846_s9 = scalar_lea.vmem %s880_s3, %s625_s5 }
  0x2d   : > { %s371_s22 = scalar_lea.vmem %s877_s0, %s370_s6 }
  0x2e   : > { %v740_v4 = vmov 0.0  }
  0x2f   : > { %397 = vst [vmem:[#allocation2] sm:$0xff] %v740_v4 }
  0x30   : > { %398 = vst [vmem:[#allocation2 + $0x8] sm:$0xf] %v740_v4 }
  0x31 PF: > { %v399_v5 = vld [vmem:[%s314_s23] sm:$0xff]  ;;  %s621_s12 = sshll.u32 %s722_s14, 7  ;;  %v408_v6 = vlaneseq  ;;  %v400_v10 = vld [vmem:[%s314_s23 + $0x8] sm:$0xf]  ;;  %v741_v17 = vmov 0   ;;  %p622_p13 = scmp.ne.s32.totalorder %s722_s14, 1 }
  0x32   : > { %v401_v7 = vld [vmem:[%s321_s24] sm:$0xff]  ;;  %v410_v9 = vstv %s621_s12  ;;  %v402_v12 = vld [vmem:[%s321_s24 + $0x8] sm:$0xf] }
  0x33   : > { %v403_v8 = vld [vmem:[%s371_s22] sm:$0x1]  ;;  %v409_v11 = vand.u32 127, %v408_v6  ;;  %v414_v14 = vsub.f32 %v399_v5, %v401_v7  ;;  %v415_v15 = vsub.f32 %v400_v10, %v402_v12 }
  0x34   : > { %vm404_vm0 = vcmp.gt.f32.partialorder %v403_v8, 1e-08 }
  0x35   : > { %v411_v13 = vadd.s32 %v410_v9, %v409_v11  ;;  %v416_v16 = vand.u32 2147483647, %v414_v14  ;;  %v417_v19 = vand.u32 2147483647, %v415_v15 }
  0x36   : > { %v423_v21 = vld [vmem:[#allocation2] sm:$0xff] }
  0x37   : > { %vm412_vm1 = vcmp.lt.s32.totalorder %v411_v13, 144  ;;  %v424_v22 = vld [vmem:[#allocation2 + $0x8] sm:$0xf] }
  0x38   : > { %vm413_vm2 = vmand %vm404_vm0, %vm412_vm1 }
  0x39   : > { %v418_v18 = vsel %vm413_vm2, 1, %v741_v17 }
  0x3a   : > { %v419_v20 = vperm.slane %v418_v18, 0 }
  0x3c   : > { %vm420_vm3 = vcmp.eq.s32.totalorder %v419_v20, 1 }
  0x3d   : > { %v421_v23 = vsel %vm420_vm3, %v416_v16, 0.0  ;;  %v422_v24 = vsel %vm420_vm3, %v417_v19, 0.0  ;;  %432 = sbr.rel (%p622_p13) target bundleno = 197 (0xc5), region = 116 }
  0x3e   : > { %v425_v25 = vadd.f32 %v423_v21, %v421_v23  ;;  %v426_v26 = vadd.f32 %v424_v22, %v422_v24 }
  0x40   : > { %427 = vst [vmem:[#allocation2] sm:$0xff] %v425_v25 }
  0x41   : > { %428 = vst [vmem:[#allocation2 + $0x8] sm:$0xf] %v426_v26 }
  0x42   : > { %vm437_vm4 = vcmask 1043456   ;;  %vm441_vm5 = vcmask 7168   ;;  %vm443_vm6 = vcmask 3072  }
  0x47   : > { %v433_v27 = vld [vmem:[#allocation2] sm:$0xff] }
  0x48   : > { %435 = vadd.xlane.f32.xlu0 %v433_v27  ;;  %v434_v28 = vld [vmem:[#allocation2 + $0x8] sm:$0xf] }
  0x49   : > { %v438_v29 = vsel %vm437_vm4, %v434_v28, 0.0 }
  0x50   : > { %439 = vadd.xlane.f32.xlu0 %v438_v29 }
  0xbb   : > { %v436_v30 = vpop.xlane.xlu0 %435 }
  0xbc   : > { %442 = vst.msk [vmem:[%s846_s9] sm:$0xff] %vm441_vm5, %v436_v30 }
  0xc3   : > { %v440_v31 = vpop.xlane.xlu0 %439 }
  0xc4   : > { %444 = vst.msk [vmem:[%s846_s9 + $0x8] sm:$0xf] %vm443_vm6, %v440_v31 }
  0xc5 PF: > { %s13_s18 = sadd.s32 1, %s738_s18   ;;  %s882_s12 = smov %s718_s13 }
  0xc6   : > { %p10_p0 = scmp.ge.s32.totalorder %s13_s18, 6   ;;  %s883_s13 = smov %s817_s26 }
  0xc7   : > { %s884_s14 = smov %s730_s16  ;;  %s885_s15 = smov %s734_s17 }
  0xc8   : > { %s886_s16 = smov %s889_s19  ;;  %s887_s17 = smov %s893_s20 }
  0xc9   :  { %12 = sbr.rel (!%p10_p0) target bundleno = 4 (0x4), region = 162 }

</bundles_post_ra>
